<compile_context>
chip_gen: v6e
topology: v6e:2x2x1
jax: 0.10.0
libtpu: 0.0.40
codegen_flags: <defaults>
</compile_context>

<pallas_src>
import functools

import jax
import jax.numpy as jnp
import numpy as np
from jax import lax
from jax.experimental import pallas as pl
from jax.experimental.pallas import tpu as pltpu


# ----------------------------- Pallas kernel -------------------------------

def _decoder_kernel(x_ref, w1_ref, b1_ref, w2_ref, b2_ref, wh_ref, bh_ref,
                    mu_ref, sg_ref, *, out_p):
    # Layouts (per grid step):
    #   x_ref : (TN, in_dim)        natural input layout
    #   w1    : (h, in_dim)   b1 : (h, 1)
    #   w2    : (h, h)        b2 : (h, 1)
    #   wh    : (2*out_p, h)  bh : (2*out_p, 1)   (mu rows, then sigma rows)
    #   mu_ref/sg_ref : (out_p, TN)               lane-dense transposed outputs
    x = x_ref[...]

    # h = W1^T . x^T  -> (h, TN); contraction over in_dim of both operands,
    # so the (TN, in_dim) tile is transposed inside VMEM, not in HBM.
    h = lax.dot_general(
        w1_ref[...], x,
        dimension_numbers=(((1,), (1,)), ((), ())),
        preferred_element_type=jnp.float32) + b1_ref[...]
    h = jnp.maximum(h, 0.0)

    h = jnp.dot(w2_ref[...], h, preferred_element_type=jnp.float32) + b2_ref[...]
    h = jnp.maximum(h, 0.0)

    # Fused heads: one (2*out_p, h) x (h, TN) matmul, then a free
    # sublane-aligned row split.
    heads = jnp.dot(wh_ref[...], h, preferred_element_type=jnp.float32) + bh_ref[...]
    mu = heads[:out_p, :]
    ps = heads[out_p:, :]

    # numerically stable softplus: max(x,0) + log1p(exp(-|x|))
    sp = jnp.maximum(ps, 0.0) + jnp.log1p(jnp.exp(-jnp.abs(ps)))

    mu_ref[...] = mu.astype(mu_ref.dtype)
    sg_ref[...] = (0.1 + 0.9 * sp).astype(sg_ref.dtype)


def _decoder_pallas(x2d, params_t, *, tile_n, out_p):
    """x2d: (N_pad, in_dim) with N_pad % tile_n == 0; params already transposed."""
    w1t, b1, w2t, b2, wh, bh = params_t
    n_pad, in_dim = x2d.shape
    h_dim = w1t.shape[0]
    grid = (n_pad // tile_n,)

    bcast = lambda shape: pl.BlockSpec(shape, lambda i: (0, 0))

    flops = 2 * n_pad * (in_dim * h_dim + h_dim * h_dim + h_dim * 2 * out_p)
    transcendentals = 2 * n_pad * out_p                     # exp + log per element
    bytes_accessed = 4 * (x2d.size + 2 * out_p * n_pad
                          + w1t.size + w2t.size + wh.size
                          + b1.size + b2.size + bh.size)
    cost = pl.CostEstimate(flops=flops,
                           transcendentals=transcendentals,
                           bytes_accessed=bytes_accessed)

    out_shapes = (jax.ShapeDtypeStruct((out_p, n_pad), x2d.dtype),
                  jax.ShapeDtypeStruct((out_p, n_pad), x2d.dtype))

    kernel = functools.partial(_decoder_kernel, out_p=out_p)

    return pl.pallas_call(
        kernel,
        out_shape=out_shapes,
        grid_spec=pltpu.PrefetchScalarGridSpec(
            num_scalar_prefetch=0,
            grid=grid,
            in_specs=[
                pl.BlockSpec((tile_n, in_dim), lambda i: (i, 0)),  # X tile (natural)
                bcast((h_dim, in_dim)),                            # W1^T
                bcast((h_dim, 1)),                                 # b1
                bcast((h_dim, h_dim)),                             # W2^T
                bcast((h_dim, 1)),                                 # b2
                bcast((2 * out_p, h_dim)),                         # [Wmu;Wsg]^T fused
                bcast((2 * out_p, 1)),                             # [bmu;bsg] fused
            ],
            out_specs=(
                pl.BlockSpec((out_p, tile_n), lambda i: (0, i)),   # mu^T
                pl.BlockSpec((out_p, tile_n), lambda i: (0, i)),   # sigma^T
            ),
        ),
        compiler_params=pltpu.CompilerParams(
            dimension_semantics=("parallel",)),
        cost_estimate=cost,
    )(x2d, w1t, b1, w2t, b2, wh, bh)


# ------------------------------ Module wrapper ------------------------------

def _round_up(a, b):
    return ((a + b - 1) // b) * b


def init_decoder_params(key, L_dim, z_dim, h_dim, out_dim, dtype=jnp.float32):
    """Init mimicking torch.nn.Linear (uniform +-1/sqrt(fan_in)); (in,out) layout."""
    in_dim = L_dim + z_dim
    ks = jax.random.split(key, 8)

    def lin(kw, kb, fan_in, fan_out):
        bound = 1.0 / np.sqrt(fan_in)
        w = jax.random.uniform(kw, (fan_in, fan_out), dtype, -bound, bound)
        b = jax.random.uniform(kb, (fan_out,), dtype, -bound, bound)
        return w, b

    w1, b1 = lin(ks[0], ks[1], in_dim, h_dim)
    w2, b2 = lin(ks[2], ks[3], h_dim, h_dim)
    wmu, bmu = lin(ks[4], ks[5], h_dim, out_dim)
    wsg, bsg = lin(ks[6], ks[7], h_dim, out_dim)
    return (w1, b1, w2, b2, wmu, bmu, wsg, bsg)


@functools.partial(jax.jit, static_argnames=("tile_n_max",))
def decoder_forward(L_z_t, params, *, tile_n_max=8192):
    """L_z_t: (..., L_dim+z_dim) -> (mu, sigma) each (..., x_dim)."""
    w1, b1, w2, b2, wmu, bmu, wsg, bsg = params
    out_dim = wmu.shape[1]
    out_p = _round_up(out_dim, 8)            # sublane-aligned head outputs

    # Pad head weights/biases along the output-feature axis (zeros), then fuse
    # the two heads into a single (2*out_p, h) weight / (2*out_p, 1) bias.
    pad_o = out_p - out_dim
    if pad_o:
        wmu = jnp.pad(wmu, ((0, 0), (0, pad_o)))
        bmu = jnp.pad(bmu, (0, pad_o))
        wsg = jnp.pad(wsg, ((0, 0), (0, pad_o)))
        bsg = jnp.pad(bsg, (0, pad_o))
    wh = jnp.concatenate([wmu.T, wsg.T], axis=0)       # (2*out_p, h)
    bh = jnp.concatenate([bmu, bsg], axis=0)[:, None]  # (2*out_p, 1)

    params_t = (w1.T, b1[:, None], w2.T, b2[:, None], wh, bh)

    lead_shape = L_z_t.shape[:-1]
    in_dim = L_z_t.shape[-1]
    x2d = L_z_t.reshape(-1, in_dim)
    n = x2d.shape[0]

    # Tiling: choose the grid length first, then the (128-aligned) lane tile,
    # so N-padding waste is bounded by grid*128 columns.  Force grid >= 2 when
    # there is enough data so both v7x TensorCores get work.
    n128 = max(128, _round_up(n, 128))
    grid_len = max(1, -(-n128 // tile_n_max))
    if grid_len == 1 and n128 >= 2 * 128:
        grid_len = 2
    tile_n = _round_up(-(-n128 // grid_len), 128)
    n_pad = grid_len * tile_n

    if n_pad != n:
        x2d = jnp.pad(x2d, ((0, n_pad - n), (0, 0)))

    muT, sgT = _decoder_pallas(x2d, params_t, tile_n=tile_n, out_p=out_p)

    mu = muT[:out_dim, :n].T.reshape(*lead_shape, out_dim)
    sigma = sgT[:out_dim, :n].T.reshape(*lead_shape, out_dim)
    return mu, sigma


# ----------------------------------- main -----------------------------------

if __name__ == "__main__":
    # config: L_dim=8, z_dim=8, dec_h_dim=32, x_dim=4
    L_dim, z_dim, h_dim, x_dim = 8, 8, 32, 4
    batch, num_points = 2, 8

    key = jax.random.PRNGKey(0)
    k_in, k_params = jax.random.split(key, 2)

    L_z_t = jax.random.normal(k_in, (batch, num_points, L_dim + z_dim), jnp.float32)
    params = init_decoder_params(k_params, L_dim, z_dim, h_dim, x_dim)

    mu, sigma = decoder_forward(L_z_t, params)
    mu = jax.block_until_ready(mu)
    sigma = jax.block_until_ready(sigma)

    # plain-JAX reference for sanity
    w1, b1, w2, b2, wmu, bmu, wsg, bsg = params
    h = jnp.maximum(L_z_t @ w1 + b1, 0.0)
    h = jnp.maximum(h @ w2 + b2, 0.0)
    mu_ref = h @ wmu + bmu
    sg_ref = 0.1 + 0.9 * jax.nn.softplus(h @ wsg + bsg)

    assert mu.shape == (batch, num_points, x_dim)
    assert sigma.shape == (batch, num_points, x_dim)
    np.testing.assert_allclose(np.asarray(mu), np.asarray(mu_ref), rtol=1e-5, atol=1e-5)
    np.testing.assert_allclose(np.asarray(sigma), np.asarray(sg_ref), rtol=1e-5, atol=1e-5)
    assert bool(jnp.all(sigma > 0.0))
    print("KERNEL_OK")
</pallas_src>

<mosaic_0001>
module attributes {stable_mosaic.version = 11 : i64} {
  func.func @_decoder_kernel(%arg0: i32, %arg1: memref<128x16xf32, #tpu.memory_space<vmem>>, %arg2: memref<32x16xf32, #tpu.memory_space<vmem>>, %arg3: memref<32x1xf32, #tpu.memory_space<vmem>>, %arg4: memref<32x32xf32, #tpu.memory_space<vmem>>, %arg5: memref<32x1xf32, #tpu.memory_space<vmem>>, %arg6: memref<16x32xf32, #tpu.memory_space<vmem>>, %arg7: memref<16x1xf32, #tpu.memory_space<vmem>>, %arg8: memref<8x128xf32, #tpu.memory_space<vmem>>, %arg9: memref<8x128xf32, #tpu.memory_space<vmem>>) attributes {dimension_semantics = [#tpu.dimension_semantics<parallel>], iteration_bounds = array<i64: 1>, scalar_prefetch = 0 : i64, scratch_operands = 0 : i64, tpu.core_type = #tpu.core_type<tc>, window_params = [{transform_indices = @transform_0, window_bounds = array<i64: 128, 16>}, {pipeline_mode = #tpu.pipeline_mode<synchronous>, transform_indices = @transform_1, window_bounds = array<i64: 32, 16>}, {pipeline_mode = #tpu.pipeline_mode<synchronous>, transform_indices = @transform_2, window_bounds = array<i64: 32, 1>}, {pipeline_mode = #tpu.pipeline_mode<synchronous>, transform_indices = @transform_3, window_bounds = array<i64: 32, 32>}, {pipeline_mode = #tpu.pipeline_mode<synchronous>, transform_indices = @transform_4, window_bounds = array<i64: 32, 1>}, {pipeline_mode = #tpu.pipeline_mode<synchronous>, transform_indices = @transform_5, window_bounds = array<i64: 16, 32>}, {pipeline_mode = #tpu.pipeline_mode<synchronous>, transform_indices = @transform_6, window_bounds = array<i64: 16, 1>}, {transform_indices = @transform_7, window_bounds = array<i64: 8, 128>}, {transform_indices = @transform_8, window_bounds = array<i64: 8, 128>}]} {
    %c0 = arith.constant 0 : index
    %c0_0 = arith.constant 0 : index
    %0 = vector.load %arg1[%c0, %c0_0] : memref<128x16xf32, #tpu.memory_space<vmem>>, vector<128x16xf32>
    %c0_1 = arith.constant 0 : index
    %c0_2 = arith.constant 0 : index
    %1 = vector.load %arg2[%c0_1, %c0_2] : memref<32x16xf32, #tpu.memory_space<vmem>>, vector<32x16xf32>
    %cst = arith.constant dense<0.000000e+00> : vector<32x128xf32>
    %2 = tpu.matmul %1, %0, %cst {dimension_numbers = #tpu.dot_dimension_numbers<[1], [1], [0], [0], [0, 0, 1, 0], [], []>} : vector<32x16xf32>, vector<128x16xf32>, vector<32x128xf32> -> vector<32x128xf32>
    %c0_3 = arith.constant 0 : index
    %c0_4 = arith.constant 0 : index
    %3 = vector.load %arg3[%c0_3, %c0_4] : memref<32x1xf32, #tpu.memory_space<vmem>>, vector<32x1xf32>
    %4 = vector.broadcast %3 : vector<32x1xf32> to vector<32x128xf32>
    %5 = arith.addf %2, %4 : vector<32x128xf32>
    %cst_5 = arith.constant 0.000000e+00 : f32
    %6 = vector.broadcast %cst_5 : f32 to vector<32x128xf32>
    %7 = arith.maximumf %5, %6 : vector<32x128xf32>
    %c0_6 = arith.constant 0 : index
    %c0_7 = arith.constant 0 : index
    %8 = vector.load %arg4[%c0_6, %c0_7] : memref<32x32xf32, #tpu.memory_space<vmem>>, vector<32x32xf32>
    %cst_8 = arith.constant dense<0.000000e+00> : vector<32x128xf32>
    %9 = tpu.matmul %8, %7, %cst_8 {dimension_numbers = #tpu.dot_dimension_numbers<[1], [0], [0], [1], [0, 0, 1, 1], [], []>} : vector<32x32xf32>, vector<32x128xf32>, vector<32x128xf32> -> vector<32x128xf32>
    %c0_9 = arith.constant 0 : index
    %c0_10 = arith.constant 0 : index
    %10 = vector.load %arg5[%c0_9, %c0_10] : memref<32x1xf32, #tpu.memory_space<vmem>>, vector<32x1xf32>
    %11 = vector.broadcast %10 : vector<32x1xf32> to vector<32x128xf32>
    %12 = arith.addf %9, %11 : vector<32x128xf32>
    %cst_11 = arith.constant 0.000000e+00 : f32
    %13 = vector.broadcast %cst_11 : f32 to vector<32x128xf32>
    %14 = arith.maximumf %12, %13 : vector<32x128xf32>
    %c0_12 = arith.constant 0 : index
    %c0_13 = arith.constant 0 : index
    %15 = vector.load %arg6[%c0_12, %c0_13] : memref<16x32xf32, #tpu.memory_space<vmem>>, vector<16x32xf32>
    %cst_14 = arith.constant dense<0.000000e+00> : vector<16x128xf32>
    %16 = tpu.matmul %15, %14, %cst_14 {dimension_numbers = #tpu.dot_dimension_numbers<[1], [0], [0], [1], [0, 0, 1, 1], [], []>} : vector<16x32xf32>, vector<32x128xf32>, vector<16x128xf32> -> vector<16x128xf32>
    %c0_15 = arith.constant 0 : index
    %c0_16 = arith.constant 0 : index
    %17 = vector.load %arg7[%c0_15, %c0_16] : memref<16x1xf32, #tpu.memory_space<vmem>>, vector<16x1xf32>
    %18 = vector.broadcast %17 : vector<16x1xf32> to vector<16x128xf32>
    %19 = arith.addf %16, %18 : vector<16x128xf32>
    %20 = vector.extract_strided_slice %19 {offsets = [0, 0], sizes = [8, 128], strides = [1, 1]} : vector<16x128xf32> to vector<8x128xf32>
    %21 = vector.extract_strided_slice %19 {offsets = [8, 0], sizes = [8, 128], strides = [1, 1]} : vector<16x128xf32> to vector<8x128xf32>
    %cst_17 = arith.constant 0.000000e+00 : f32
    %22 = vector.broadcast %cst_17 : f32 to vector<8x128xf32>
    %23 = arith.maximumf %21, %22 : vector<8x128xf32>
    %24 = math.absf %21 : vector<8x128xf32>
    %cst_18 = arith.constant 0.000000e+00 : f32
    %25 = vector.broadcast %cst_18 : f32 to vector<8x128xf32>
    %26 = arith.subf %25, %24 : vector<8x128xf32>
    %27 = math.exp %26 : vector<8x128xf32>
    %28 = math.log1p %27 : vector<8x128xf32>
    %29 = arith.addf %23, %28 : vector<8x128xf32>
    %c0_19 = arith.constant 0 : index
    %c0_20 = arith.constant 0 : index
    %30 = vector.load %arg8[%c0_19, %c0_20] : memref<8x128xf32, #tpu.memory_space<vmem>>, vector<8x128xf32>
    tpu.vector_store %arg8[%c0_19, %c0_20], %20 {strides = array<i32>} : memref<8x128xf32, #tpu.memory_space<vmem>>, vector<8x128xf32>,
    %cst_21 = arith.constant 0.899999976 : f32
    %31 = vector.broadcast %cst_21 : f32 to vector<8x128xf32>
    %32 = arith.mulf %31, %29 : vector<8x128xf32>
    %cst_22 = arith.constant 1.000000e-01 : f32
    %33 = vector.broadcast %cst_22 : f32 to vector<8x128xf32>
    %34 = arith.addf %33, %32 : vector<8x128xf32>
    %c0_23 = arith.constant 0 : index
    %c0_24 = arith.constant 0 : index
    %35 = vector.load %arg9[%c0_23, %c0_24] : memref<8x128xf32, #tpu.memory_space<vmem>>, vector<8x128xf32>
    tpu.vector_store %arg9[%c0_23, %c0_24], %34 {strides = array<i32>} : memref<8x128xf32, #tpu.memory_space<vmem>>, vector<8x128xf32>,
    return
  }
  func.func @transform_0(%arg0: i32) -> (i32, i32) {
    %c0_i32 = arith.constant 0 : i32
    %c0_i32_0 = arith.constant 0 : i32
    return %arg0, %c0_i32 : i32, i32
  }
  func.func @transform_1(%arg0: i32) -> (i32, i32) {
    %c0_i32 = arith.constant 0 : i32
    %c0_i32_0 = arith.constant 0 : i32
    %c0_i32_1 = arith.constant 0 : i32
    return %c0_i32, %c0_i32_0 : i32, i32
  }
  func.func @transform_2(%arg0: i32) -> (i32, i32) {
    %c0_i32 = arith.constant 0 : i32
    %c0_i32_0 = arith.constant 0 : i32
    %c0_i32_1 = arith.constant 0 : i32
    return %c0_i32, %c0_i32_0 : i32, i32
  }
  func.func @transform_3(%arg0: i32) -> (i32, i32) {
    %c0_i32 = arith.constant 0 : i32
    %c0_i32_0 = arith.constant 0 : i32
    %c0_i32_1 = arith.constant 0 : i32
    return %c0_i32, %c0_i32_0 : i32, i32
  }
  func.func @transform_4(%arg0: i32) -> (i32, i32) {
    %c0_i32 = arith.constant 0 : i32
    %c0_i32_0 = arith.constant 0 : i32
    %c0_i32_1 = arith.constant 0 : i32
    return %c0_i32, %c0_i32_0 : i32, i32
  }
  func.func @transform_5(%arg0: i32) -> (i32, i32) {
    %c0_i32 = arith.constant 0 : i32
    %c0_i32_0 = arith.constant 0 : i32
    %c0_i32_1 = arith.constant 0 : i32
    return %c0_i32, %c0_i32_0 : i32, i32
  }
  func.func @transform_6(%arg0: i32) -> (i32, i32) {
    %c0_i32 = arith.constant 0 : i32
    %c0_i32_0 = arith.constant 0 : i32
    %c0_i32_1 = arith.constant 0 : i32
    return %c0_i32, %c0_i32_0 : i32, i32
  }
  func.func @transform_7(%arg0: i32) -> (i32, i32) {
    %c0_i32 = arith.constant 0 : i32
    %c0_i32_0 = arith.constant 0 : i32
    return %c0_i32, %arg0 : i32, i32
  }
  func.func @transform_8(%arg0: i32) -> (i32, i32) {
    %c0_i32 = arith.constant 0 : i32
    %c0_i32_0 = arith.constant 0 : i32
    return %c0_i32, %arg0 : i32, i32
  }
}

</mosaic_0001>

<bundles_post_ra>
// kernel: decoder_forward.1
= control target key start
LH: loop header
LB: loop body
LE: loop exit
PB: predicated region body
PF: predicated region fallthrough
CT: control target
= control target key end

     0   :  { %vm72_vm0 = vcmask 130048   ;;  %v604_v2 = vmov 0   ;;  %vm250_vm1 = vcmask 261120   ;;  %s806_s0 = inlined_call_operand.vmem [shape: f32[128,16], index: 0, kind: input, shape index: {}]   ;;  %s807_s1 = inlined_call_operand.vmem [shape: f32[32,16], index: 1, kind: input, shape index: {}]   ;;  %s808_s2 = inlined_call_operand.vmem [shape: f32[32,1], index: 2, kind: input, shape index: {}]   ;;  %s809_s4 = inlined_call_operand.vmem [shape: f32[32,1], index: 4, kind: input, shape index: {}]   ;;  %s810_s6 = inlined_call_operand.vmem [shape: f32[16,1], index: 6, kind: input, shape index: {}]   ;;  %s811_s3 = inlined_call_operand.vmem [shape: f32[32,32], index: 3, kind: input, shape index: {}]   ;;  %s812_s5 = inlined_call_operand.vmem [shape: f32[16,32], index: 5, kind: input, shape index: {}]   ;;  %s813_s7 = inlined_call_operand.vmem [shape: f32[8,128], index: 7, kind: output, shape index: {0}]   ;;  %s814_s8 = inlined_call_operand.vmem [shape: f32[8,128], index: 8, kind: output, shape index: {1}]  }
   0x1   :  { %v43_v0 = vld [vmem:[%s806_s0 + $0x78] sm:$0xff]  ;;  %v42_v1 = vld [vmem:[%s806_s0 + $0x70] sm:$0xff]  ;;  %598 = vset.pattern.permute.xlu0 %v604_v2  ;;  %599 = vset.pattern.permute.xlu1 %v604_v2  ;;  %v41_v3 = vld [vmem:[%s806_s0 + $0x68] sm:$0xff] }
   0x2   :  { %534 = vmatprep.subr.msk.mxu0 %vm72_vm0, %v43_v0  ;;  %v44_v4 = vld [vmem:[%s807_s1] sm:$0xff]  ;;  %v51_v5 = vld [vmem:[%s808_s2 + $0x18] sm:$0xff]  ;;  %v49_v6 = vld [vmem:[%s808_s2 + $0x8] sm:$0xff] }
   0x3   :  { %535 = vmatpush3.xpose.msk.msra.mxu0 %vm72_vm0, %v43_v0  ;;  %566 = vmatprep.mubr.msk.f32.mxu0 %vm72_vm0, %v44_v4  ;;  %v40_v7 = vld [vmem:[%s806_s0 + $0x60] sm:$0xff]  ;;  %v50_v8 = vld [vmem:[%s808_s2 + $0x10] sm:$0xff]  ;;  %v39_v10 = vld [vmem:[%s806_s0 + $0x58] sm:$0xff] }
   0x4   :  { %536 = vmatprep.subr.msk.mxu0 %vm72_vm0, %v42_v1  ;;  %69 = vperm.xlu0 %598, %v51_v5   ;;  %v48_v9 = vld [vmem:[%s808_s2] sm:$0xff]  ;;  %v229_v11 = vld [vmem:[%s809_s4 + $0x18] sm:$0xff]  ;;  %v228_v12 = vld [vmem:[%s809_s4 + $0x10] sm:$0xff] }
   0x5   :  { %59 = vperm.xlu1 %599, %v49_v6   ;;  %v38_v13 = vld [vmem:[%s806_s0 + $0x50] sm:$0xff]  ;;  %v227_v14 = vld [vmem:[%s809_s4 + $0x8] sm:$0xff]  ;;  %v226_v15 = vld [vmem:[%s809_s4] sm:$0xff] }
   0x6   :  { %v37_v16 = vld [vmem:[%s806_s0 + $0x48] sm:$0xff]  ;;  %v354_v18 = vld [vmem:[%s810_s6] sm:$0xff]  ;;  %v35_v20 = vld [vmem:[%s806_s0 + $0x38] sm:$0xff] }
   0x7   :  { %537 = vmatpush3.xpose.msk.msra.mxu0 %vm72_vm0, %v42_v1  ;;  %v355_v17 = vld [vmem:[%s810_s6 + $0x8] sm:$0xff]  ;;  %v36_v19 = vld [vmem:[%s806_s0 + $0x40] sm:$0xff]  ;;  %v34_v21 = vld [vmem:[%s806_s0 + $0x30] sm:$0xff] }
   0x8   :  { %538 = vmatprep.subr.msk.mxu0 %vm72_vm0, %v41_v3  ;;  %64 = vperm.xlu0 %598, %v50_v8   ;;  %v33_v22 = vld [vmem:[%s806_s0 + $0x28] sm:$0xff]  ;;  %v32_v23 = vld [vmem:[%s806_s0 + $0x20] sm:$0xff]  ;;  %v31_v24 = vld [vmem:[%s806_s0 + $0x18] sm:$0xff] }
   0x9   :  { %54 = vperm.xlu1 %599, %v48_v9   ;;  %v30_v25 = vld [vmem:[%s806_s0 + $0x10] sm:$0xff]  ;;  %v29_v26 = vld [vmem:[%s806_s0 + $0x8] sm:$0xff]  ;;  %v28_v27 = vld [vmem:[%s806_s0] sm:$0xff] }
   0xa   :  { %v45_v28 = vld [vmem:[%s807_s1 + $0x8] sm:$0xff]  ;;  %v46_v29 = vld [vmem:[%s807_s1 + $0x10] sm:$0xff]  ;;  %v47_v30 = vld [vmem:[%s807_s1 + $0x18] sm:$0xff] }
   0xb   :  { %539 = vmatpush3.xpose.msk.msra.mxu0 %vm72_vm0, %v41_v3  ;;  %v222_v31 = vld [vmem:[%s811_s3] sm:$0xff]  ;;  %v223_v48 = vld [vmem:[%s811_s3 + $0x8] sm:$0xff]  ;;  %v224_v49 = vld [vmem:[%s811_s3 + $0x10] sm:$0xff] }
   0xc   :  { %540 = vmatprep.subr.msk.mxu0 %vm72_vm0, %v40_v7  ;;  %247 = vperm.xlu0 %598, %v229_v11   ;;  %v225_v50 = vld [vmem:[%s811_s3 + $0x18] sm:$0xff]  ;;  %v352_v51 = vld [vmem:[%s812_s5] sm:$0xff]  ;;  %v353_v4 = vld [vmem:[%s812_s5 + $0x8] sm:$0xff] }
   0xd   :  { %242 = vperm.xlu1 %599, %v228_v12   ;;  %580 = vmatprep.mubr.msk.f32.mxu1 %vm250_vm1, %v222_v31 }
   0xf   :  { %541 = vmatpush3.xpose.msk.msra.mxu0 %vm72_vm0, %v40_v7 }
  0x10   :  { %542 = vmatprep.subr.msk.mxu0 %vm72_vm0, %v39_v10  ;;  %237 = vperm.xlu0 %598, %v227_v14  }
  0x11   :  { %232 = vperm.xlu1 %599, %v226_v15  }
  0x13   :  { %543 = vmatpush3.xpose.msk.msra.mxu0 %vm72_vm0, %v39_v10 }
  0x14   :  { %544 = vmatprep.subr.msk.mxu0 %vm72_vm0, %v38_v13  ;;  %363 = vperm.xlu0 %598, %v355_v17  }
  0x15   :  { %358 = vperm.xlu1 %599, %v354_v18  }
  0x17   :  { %545 = vmatpush3.xpose.msk.msra.mxu0 %vm72_vm0, %v38_v13 }
  0x18   :  { %546 = vmatprep.subr.msk.mxu0 %vm72_vm0, %v37_v16 }
  0x1b   :  { %547 = vmatpush3.xpose.msk.msra.mxu0 %vm72_vm0, %v37_v16 }
  0x1c   :  { %548 = vmatprep.subr.msk.mxu0 %vm72_vm0, %v36_v19 }
  0x1f   :  { %549 = vmatpush3.xpose.msk.msra.mxu0 %vm72_vm0, %v36_v19 }
  0x20   :  { %550 = vmatprep.subr.msk.mxu0 %vm72_vm0, %v35_v20 }
  0x23   :  { %551 = vmatpush3.xpose.msk.msra.mxu0 %vm72_vm0, %v35_v20 }
  0x24   :  { %552 = vmatprep.subr.msk.mxu0 %vm72_vm0, %v34_v21 }
  0x27   :  { %553 = vmatpush3.xpose.msk.msra.mxu0 %vm72_vm0, %v34_v21 }
  0x28   :  { %554 = vmatprep.subr.msk.mxu0 %vm72_vm0, %v33_v22 }
  0x2b   :  { %555 = vmatpush3.xpose.msk.msra.mxu0 %vm72_vm0, %v33_v22 }
  0x2c   :  { %556 = vmatprep.subr.msk.mxu0 %vm72_vm0, %v32_v23 }
  0x2f   :  { %557 = vmatpush3.xpose.msk.msra.mxu0 %vm72_vm0, %v32_v23 }
  0x30   :  { %558 = vmatprep.subr.msk.mxu0 %vm72_vm0, %v31_v24 }
  0x33   :  { %559 = vmatpush3.xpose.msk.msra.mxu0 %vm72_vm0, %v31_v24 }
  0x34   :  { %560 = vmatprep.subr.msk.mxu0 %vm72_vm0, %v30_v25 }
  0x37   :  { %561 = vmatpush3.xpose.msk.msra.mxu0 %vm72_vm0, %v30_v25 }
  0x38   :  { %562 = vmatprep.subr.msk.mxu0 %vm72_vm0, %v29_v26 }
  0x3b   :  { %563 = vmatpush3.xpose.msk.msra.mxu0 %vm72_vm0, %v29_v26 }
  0x3c   :  { %564 = vmatprep.subr.msk.mxu0 %vm72_vm0, %v28_v27 }
  0x3f   :  { %565 = vmatpush3.xpose.msk.msra.mxu0 %vm72_vm0, %v28_v27 }
  0x42   :  { %567 = vmatmul.mubr.msk.f32.vlgmr.msra.gmra.mxu0 %vm72_vm0, %v45_v28 }
  0x43   :  { %569 = vmatprep.mubr.msk.f32.mxu0 %vm72_vm0, %v46_v29 }
  0x46   :  { %570 = vmatmul.mubr.msk.f32.gmra.mxu0 %vm72_vm0, %v47_v30 }
  0x7f   :  { %v70_v32 = vpop.permute.xlu0 %69 }
  0x80   :  { %v60_v34 = vpop.permute.xlu1 %59 }
  0x83   :  { %v65_v38 = vpop.permute.xlu0 %64 }
  0x84   :  { %v55_v43 = vpop.permute.xlu1 %54 }
  0x87   :  { %v248_v52 = vpop.permute.xlu0 %247 }
  0x88   :  { %v243_v54 = vpop.permute.xlu1 %242 }
  0x8b   :  { %v238_v58 = vpop.permute.xlu0 %237 }
  0x8c   :  { %v233_v63 = vpop.permute.xlu1 %232 }
  0x8f   :  { %v364_v5 = vpop.permute.xlu0 %363 }
  0x90   :  { %v359_v8 = vpop.permute.xlu1 %358 }
 0x102   :  { %v568_v33 = vpop.f32.mrf.mxu0 }
 0x103   :  { %v205_v40 = vadd.f32 %v568_v33, %v60_v34 }
 0x104   :  { %v199_v35 = vpop.f32.mrf.mxu0 }
 0x105   :  { %v200_v44 = vadd.f32 %v199_v35, %v55_v43  ;;  %v219_v46 = vmax.f32 %v205_v40, 0.0 }
 0x106   :  { %v571_v36 = vpop.f32.mrf.mxu0 }
 0x107   :  { %v215_v37 = vadd.f32 %v571_v36, %v70_v32  ;;  %v218_v47 = vmax.f32 %v200_v44, 0.0 }
 0x108   :  { %v209_v39 = vpop.f32.mrf.mxu0 }
 0x109   :  { %v221_v41 = vmax.f32 %v215_v37, 0.0  ;;  %v210_v42 = vadd.f32 %v209_v39, %v65_v38 }
 0x10b   :  { %v220_v45 = vmax.f32 %v210_v42, 0.0  ;;  %572 = vmatprep.subr.mxu1 %v221_v41 }
 0x10c   :  { %573 = vmatpush3.msra.mxu1 %v221_v41 }
 0x10d   :  { %574 = vmatprep.subr.mxu1 %v220_v45 }
 0x10e   :  { %575 = vmatpush3.msra.mxu1 %v220_v45 }
 0x10f   :  { %576 = vmatprep.subr.mxu1 %v219_v46 }
 0x110   :  { %577 = vmatpush3.msra.mxu1 %v219_v46 }
 0x111   :  { %578 = vmatprep.subr.mxu1 %v218_v47 }
 0x112   :  { %579 = vmatpush3.msra.mxu1 %v218_v47 }
 0x113   :  { %581 = vmatmul.mubr.msk.f32.vlgmr.msra.gmra.mxu1 %vm250_vm1, %v223_v48 }
 0x114   :  { %583 = vmatprep.mubr.msk.f32.mxu1 %vm250_vm1, %v224_v49 }
 0x117   :  { %584 = vmatmul.mubr.msk.f32.gmra.mxu1 %vm250_vm1, %v225_v50 }
 0x118   :  { %594 = vmatprep.mubr.msk.f32.mxu1 %vm250_vm1, %v352_v51 }
 0x1d3   :  { %v582_v53 = vpop.f32.mrf.mxu1 }
 0x1d4   :  { %v335_v60 = vadd.f32 %v582_v53, %v238_v58 }
 0x1d5   :  { %v329_v55 = vpop.f32.mrf.mxu1 }
 0x1d6   :  { %v330_v0 = vadd.f32 %v329_v55, %v233_v63  ;;  %v349_v2 = vmax.f32 %v335_v60, 0.0 }
 0x1d7   :  { %v585_v56 = vpop.f32.mrf.mxu1 }
 0x1d8   :  { %v345_v57 = vadd.f32 %v585_v56, %v248_v52  ;;  %v348_v3 = vmax.f32 %v330_v0, 0.0 }
 0x1d9   :  { %v339_v59 = vpop.f32.mrf.mxu1 }
 0x1da   :  { %v351_v61 = vmax.f32 %v345_v57, 0.0  ;;  %v340_v62 = vadd.f32 %v339_v59, %v243_v54 }
 0x1dc   :  { %v350_v1 = vmax.f32 %v340_v62, 0.0  ;;  %586 = vmatprep.subr.mxu1 %v351_v61 }
 0x1dd   :  { %587 = vmatpush3.msra.mxu1 %v351_v61 }
 0x1de   :  { %588 = vmatprep.subr.mxu1 %v350_v1 }
 0x1df   :  { %589 = vmatpush3.msra.mxu1 %v350_v1 }
 0x1e0   :  { %590 = vmatprep.subr.mxu1 %v349_v2 }
 0x1e1   :  { %591 = vmatpush3.msra.mxu1 %v349_v2 }
 0x1e2   :  { %592 = vmatprep.subr.mxu1 %v348_v3 }
 0x1e3   :  { %593 = vmatpush3.msra.mxu1 %v348_v3 }
 0x1e4   :  { %595 = vmatmul.mubr.msk.f32.vlgmr.msra.gmra.mxu1 %vm250_vm1, %v353_v4 }
 0x2a4   :  { %v596_v6 = vpop.f32.mrf.mxu1 }
 0x2a5   :  { %v444_v7 = vadd.f32 %v596_v6, %v364_v5 }
 0x2a6   :  { %v438_v9 = vpop.f32.mrf.mxu1 }
 0x2a7   :  { %v448_v10 = vand.u32 2147483647, %v444_v7  ;;  %v439_v11 = vadd.f32 %v438_v9, %v359_v8  ;;  %v447_v22 = vmax.f32 %v444_v7, 0.0 }
 0x2a9   :  { %v449_v12 = vsub.f32 0.0, %v448_v10  ;;  %462 = vst [vmem:[%s813_s7] sm:$0xff] %v439_v11 }
 0x2ab   :  { %v450_v13 = vmul.f32 1.442695, %v449_v12 }
 0x2ad   :  { %600 = vpow2.f32 %v450_v13 }
 0x2ba   :  { %v601_v14 = vpop.eup %600 }
 0x2bb   :  { %v452_v15 = vadd.f32 1.0, %v601_v14  ;;  %v455_v16 = vmul.f32 -0.5, %v601_v14  ;;  %v458_v18 = vand.u32 2147483647, %v601_v14 }
 0x2bd   :  { %602 = vlog2.f32 %v452_v15  ;;  %v456_v17 = vadd.f32 1.0, %v455_v16  ;;  %vm459_vm2 = vcmp.lt.f32.partialorder %v458_v18, 0.0004427343 }
 0x2bf   :  { %v457_v21 = vmul.f32 %v601_v14, %v456_v17 }
 0x2ca   :  { %v603_v19 = vpop.eup %602 }
 0x2cb   :  { %v454_v20 = vmul.f32 0.6931472, %v603_v19 }
 0x2cd   :  { %v460_v23 = vsel %vm459_vm2, %v457_v21, %v454_v20 }
 0x2ce   :  { %v461_v24 = vadd.f32 %v460_v23, %v447_v22 }
 0x2d0   :  { %v463_v25 = vmul.f32 0.9, %v461_v24 }
 0x2d2   :  { %v464_v26 = vadd.f32 0.1, %v463_v25 }
 0x2d4   :  { %465 = vst [vmem:[%s814_s8] sm:$0xff] %v464_v26 }

</bundles_post_ra>
